<compile_context>
chip_gen: v5e
topology: v5e:2x2
jax: 0.10.0
libtpu: 0.0.40
codegen_flags: <defaults>
</compile_context>

<pallas_src>
import numpy as np
import jax
import jax.numpy as jnp
from jax import lax
from jax.experimental import pallas as pl
from jax.experimental.pallas import tpu as pltpu

# ---- small shapes consistent with the module (scaled-down n_embd) ----
B = 2            # batch
T = 8            # sequence length (<= block_size=256; tril[:T,:T] causal mask)
N_EMBD = 32      # embedding dim (stand-in for 384)
N_HEAD = 4
HEAD_SIZE = N_EMBD // N_HEAD
SCALE = float(N_EMBD) ** -0.5          # reference uses C**-0.5 with C = n_embd

BT = B * T                  # 16 query rows (all batches)
HBT = N_HEAD * B * T        # 64 key rows (head-major, then batch, then key)


def mha_kernel(x_ref, wq_ref, wk_ref, wv_ref, wp_ref, bp_ref,
               kvm_ref, smask_ref, o_ref):
    """Single grid step: whole batch, all heads.

    x_ref     : (B, T, C)
    wq_ref    : (C, C)  head-major Q columns, attention scale folded in
    wk_ref    : (C, C)  head-major K columns
    wv_ref    : (C, C)  head-major V columns
    wp_ref    : (C, C)  output projection
    bp_ref    : (1, C)  output projection bias
    kvm_ref   : (H*B*T, C)  0/1 head-block channel mask for K_rows/V_rows
    smask_ref : (B*T, H*B*T) additive score mask (0 valid / -1e30 masked)
    o_ref     : (B, T, C)
    """
    C = N_EMBD

    # (B, T, C) -> (B*T, C): collapse of leading dims, layout-preserving.
    x2d = x_ref[...].reshape(BT, C)

    # --- Q/K/V projections: three single-push dots (no lane-offset slicing) --
    q = jnp.dot(x2d, wq_ref[...], preferred_element_type=jnp.float32)  # (BT, C), pre-scaled
    k = jnp.dot(x2d, wk_ref[...], preferred_element_type=jnp.float32)  # (BT, C)
    v = jnp.dot(x2d, wv_ref[...], preferred_element_type=jnp.float32)  # (BT, C)

    # --- head x batch block-diagonal K/V row slabs -------------------------
    # Row j = h*(B*T) + b*T + s : head h's slice of (batch b, key s).
    kv_mask = kvm_ref[...]                                     # (HBT, C) 0/1
    k_rows = jnp.concatenate([k] * N_HEAD, axis=0) * kv_mask   # (HBT, C)
    v_rows = jnp.concatenate([v] * N_HEAD, axis=0) * kv_mask   # (HBT, C)

    # --- ALL heads & ALL batches' scores in ONE matmul ---------------------
    # S[(b,t), (h,b',s)] = q_h[b,t] . k_h[b',s]; off-head channels are zeroed.
    s = lax.dot_general(q, k_rows, (((1,), (1,)), ((), ())),
                        preferred_element_type=jnp.float32)    # (BT, HBT)
    # Additive mask: 0 where (b == b' and s <= t), -1e30 elsewhere (causal +
    # cross-batch).  Must be applied BEFORE the query-axis softmax so batches
    # don't enter each other's normalization.
    s = s + smask_ref[...]

    # Reference quirk: F.softmax(wei, dim=1) normalises over the QUERY axis.
    # Every column has >= 1 valid entry (t = s in its own batch), so the
    # column max is finite and masked entries underflow to exactly 0.
    m = jnp.max(s, axis=0, keepdims=True)
    e = jnp.exp(s - m)
    inv = pl.reciprocal(jnp.sum(e, axis=0, keepdims=True), approx=True)
    w = e * inv                                                # (BT, HBT)

    # ONE value matmul: cross-batch weights are 0, off-head V channels are 0,
    # so this directly yields the head-major concatenated attention output.
    att = jnp.dot(w, v_rows, preferred_element_type=jnp.float32)   # (BT, C)

    # Output projection (+ bias).  Dropout layers are identity in eval mode.
    y = jnp.dot(att, wp_ref[...], preferred_element_type=jnp.float32) + bp_ref[...]

    o_ref[...] = y.reshape(B, T, C).astype(o_ref.dtype)


def _build_masks():
    """Host-side constant masks (computed once, passed as tiny VMEM inputs)."""
    # Head-block channel mask for K_rows / V_rows: row j -> head = j // (B*T).
    row_head = (np.arange(HBT) // BT)[:, None]                 # (HBT, 1)
    col_head = (np.arange(N_EMBD) // HEAD_SIZE)[None, :]       # (1, C)
    kv_mask = (row_head == col_head).astype(np.float32)        # (HBT, C)

    # Additive score mask on the (query (b,t), key (h,b',s)) slab.
    i = np.arange(BT)
    b_of_i, t_of_i = i // T, i % T
    j = np.arange(HBT)
    r = j % BT
    b_of_j, s_of_j = r // T, r % T
    valid = (b_of_i[:, None] == b_of_j[None, :]) & (s_of_j[None, :] <= t_of_i[:, None])
    score_mask = np.where(valid, 0.0, -1e30).astype(np.float32)  # (BT, HBT)
    return jnp.asarray(kv_mask), jnp.asarray(score_mask)


def fuse_params(params):
    """One-time parameter preparation (hoisted out of the per-call path)."""
    wk, wq, wv, wp, bp = params
    # Head-major column concat of the per-head projection weights; fold the
    # attention scale C**-0.5 into the Q weight.
    wq_s = jnp.concatenate([wq[h] for h in range(N_HEAD)], axis=1) * SCALE  # (C, C)
    wk_c = jnp.concatenate([wk[h] for h in range(N_HEAD)], axis=1)          # (C, C)
    wv_c = jnp.concatenate([wv[h] for h in range(N_HEAD)], axis=1)          # (C, C)
    bp2 = bp.reshape(1, N_EMBD)
    kv_mask, score_mask = _build_masks()
    return (wq_s, wk_c, wv_c, wp, bp2, kv_mask, score_mask)


@jax.jit
def mha_forward(x, fused):
    """fused = output of fuse_params; x is (B, T, C)."""
    wq_s, wk_c, wv_c, wp, bp2, kv_mask, score_mask = fused

    def _full(a):
        nd = a.ndim
        return pl.BlockSpec(a.shape, lambda i, _nd=nd: (0,) * _nd)

    return pl.pallas_call(
        mha_kernel,
        out_shape=jax.ShapeDtypeStruct((B, T, N_EMBD), x.dtype),
        grid_spec=pltpu.PrefetchScalarGridSpec(
            num_scalar_prefetch=0,
            grid=(1,),   # single step on every generation (latency-bound shapes)
            in_specs=[
                _full(x),
                _full(wq_s), _full(wk_c), _full(wv_c),
                _full(wp), _full(bp2),
                _full(kv_mask), _full(score_mask),
            ],
            out_specs=pl.BlockSpec((B, T, N_EMBD), lambda i: (0, 0, 0)),
        ),
        compiler_params=pltpu.CompilerParams(
            dimension_semantics=("arbitrary",)),
    )(x, wq_s, wk_c, wv_c, wp, bp2, kv_mask, score_mask)


def reference(x, params):
    """Pure-JAX mirror of the PyTorch forward (eval mode)."""
    wk, wq, wv, wp, bp = params
    outs = []
    mask = jnp.tril(jnp.ones((T, T), dtype=bool))
    for h in range(N_HEAD):
        k = x @ wk[h]
        q = x @ wq[h]
        v = x @ wv[h]
        wei = q @ jnp.swapaxes(k, -1, -2) * SCALE
        wei = jnp.where(mask, wei, -jnp.inf)
        wei = jax.nn.softmax(wei, axis=1)        # dim=1 quirk of the reference
        outs.append(wei @ v)
    out = jnp.concatenate(outs, axis=-1)
    return out @ wp + bp.reshape(1, N_EMBD)


def make_params(key):
    ks = jax.random.split(key, 5)
    s = 0.02
    wk = jax.random.normal(ks[0], (N_HEAD, N_EMBD, HEAD_SIZE), jnp.float32) * s
    wq = jax.random.normal(ks[1], (N_HEAD, N_EMBD, HEAD_SIZE), jnp.float32) * s
    wv = jax.random.normal(ks[2], (N_HEAD, N_EMBD, HEAD_SIZE), jnp.float32) * s
    wp = jax.random.normal(ks[3], (N_EMBD, N_EMBD), jnp.float32) * s
    bp = jax.random.normal(ks[4], (N_EMBD,), jnp.float32) * s
    return (wk, wq, wv, wp, bp)


if __name__ == "__main__":
    key = jax.random.PRNGKey(0)
    kx, kp = jax.random.split(key)
    x = jax.random.normal(kx, (B, T, N_EMBD), jnp.float32)
    params = make_params(kp)

    # One-time parameter / mask preparation (not on the steady-state path).
    fused = fuse_params(params)

    ref = reference(x, params)

    # Tolerance covers the EUP approximate-reciprocal softmax normalisation,
    # the pre-folded attention scale, and MXU f32 multi-pass rounding.
    tol = dict(rtol=1e-3, atol=2e-4)

    out = jax.block_until_ready(mha_forward(x, fused))
    np.testing.assert_allclose(np.asarray(out), np.asarray(ref), **tol)

    print("KERNEL_OK")
</pallas_src>

<mosaic_0001>
module attributes {stable_mosaic.version = 11 : i64} {
  func.func @mha_kernel(%arg0: i32, %arg1: memref<2x8x32xf32, #tpu.memory_space<vmem>>, %arg2: memref<32x32xf32, #tpu.memory_space<vmem>>, %arg3: memref<32x32xf32, #tpu.memory_space<vmem>>, %arg4: memref<32x32xf32, #tpu.memory_space<vmem>>, %arg5: memref<32x32xf32, #tpu.memory_space<vmem>>, %arg6: memref<1x32xf32, #tpu.memory_space<vmem>>, %arg7: memref<64x32xf32, #tpu.memory_space<vmem>>, %arg8: memref<16x64xf32, #tpu.memory_space<vmem>>, %arg9: memref<2x8x32xf32, #tpu.memory_space<vmem>>) attributes {dimension_semantics = [#tpu.dimension_semantics<arbitrary>], iteration_bounds = array<i64: 1>, scalar_prefetch = 0 : i64, scratch_operands = 0 : i64, tpu.core_type = #tpu.core_type<tc>, window_params = [{pipeline_mode = #tpu.pipeline_mode<synchronous>, transform_indices = @transform_0, window_bounds = array<i64: 2, 8, 32>}, {pipeline_mode = #tpu.pipeline_mode<synchronous>, transform_indices = @transform_1, window_bounds = array<i64: 32, 32>}, {pipeline_mode = #tpu.pipeline_mode<synchronous>, transform_indices = @transform_2, window_bounds = array<i64: 32, 32>}, {pipeline_mode = #tpu.pipeline_mode<synchronous>, transform_indices = @transform_3, window_bounds = array<i64: 32, 32>}, {pipeline_mode = #tpu.pipeline_mode<synchronous>, transform_indices = @transform_4, window_bounds = array<i64: 32, 32>}, {pipeline_mode = #tpu.pipeline_mode<synchronous>, transform_indices = @transform_5, window_bounds = array<i64: 1, 32>}, {pipeline_mode = #tpu.pipeline_mode<synchronous>, transform_indices = @transform_6, window_bounds = array<i64: 64, 32>}, {pipeline_mode = #tpu.pipeline_mode<synchronous>, transform_indices = @transform_7, window_bounds = array<i64: 16, 64>}, {pipeline_mode = #tpu.pipeline_mode<synchronous>, transform_indices = @transform_8, window_bounds = array<i64: 2, 8, 32>}]} {
    %c0 = arith.constant 0 : index
    %c0_0 = arith.constant 0 : index
    %c0_1 = arith.constant 0 : index
    %0 = vector.load %arg1[%c0, %c0_0, %c0_1] : memref<2x8x32xf32, #tpu.memory_space<vmem>>, vector<2x8x32xf32>
    %1 = vector.shape_cast %0 : vector<2x8x32xf32> to vector<16x32xf32>
    %c0_2 = arith.constant 0 : index
    %c0_3 = arith.constant 0 : index
    %2 = vector.load %arg2[%c0_2, %c0_3] : memref<32x32xf32, #tpu.memory_space<vmem>>, vector<32x32xf32>
    %cst = arith.constant dense<0.000000e+00> : vector<16x32xf32>
    %3 = tpu.matmul %1, %2, %cst {dimension_numbers = #tpu.dot_dimension_numbers<[1], [0], [0], [1], [0, 0, 1, 1], [], []>} : vector<16x32xf32>, vector<32x32xf32>, vector<16x32xf32> -> vector<16x32xf32>
    %c0_4 = arith.constant 0 : index
    %c0_5 = arith.constant 0 : index
    %4 = vector.load %arg3[%c0_4, %c0_5] : memref<32x32xf32, #tpu.memory_space<vmem>>, vector<32x32xf32>
    %cst_6 = arith.constant dense<0.000000e+00> : vector<16x32xf32>
    %5 = tpu.matmul %1, %4, %cst_6 {dimension_numbers = #tpu.dot_dimension_numbers<[1], [0], [0], [1], [0, 0, 1, 1], [], []>} : vector<16x32xf32>, vector<32x32xf32>, vector<16x32xf32> -> vector<16x32xf32>
    %c0_7 = arith.constant 0 : index
    %c0_8 = arith.constant 0 : index
    %6 = vector.load %arg4[%c0_7, %c0_8] : memref<32x32xf32, #tpu.memory_space<vmem>>, vector<32x32xf32>
    %cst_9 = arith.constant dense<0.000000e+00> : vector<16x32xf32>
    %7 = tpu.matmul %1, %6, %cst_9 {dimension_numbers = #tpu.dot_dimension_numbers<[1], [0], [0], [1], [0, 0, 1, 1], [], []>} : vector<16x32xf32>, vector<32x32xf32>, vector<16x32xf32> -> vector<16x32xf32>
    %c0_10 = arith.constant 0 : index
    %c0_11 = arith.constant 0 : index
    %8 = vector.load %arg7[%c0_10, %c0_11] : memref<64x32xf32, #tpu.memory_space<vmem>>, vector<64x32xf32>
    %9 = tpu.concatenate %5, %5, %5, %5 in 0 : vector<16x32xf32>, vector<16x32xf32>, vector<16x32xf32>, vector<16x32xf32> -> vector<64x32xf32>
    %10 = arith.mulf %9, %8 : vector<64x32xf32>
    %11 = tpu.concatenate %7, %7, %7, %7 in 0 : vector<16x32xf32>, vector<16x32xf32>, vector<16x32xf32>, vector<16x32xf32> -> vector<64x32xf32>
    %12 = arith.mulf %11, %8 : vector<64x32xf32>
    %cst_12 = arith.constant dense<0.000000e+00> : vector<16x64xf32>
    %13 = tpu.matmul %3, %10, %cst_12 {dimension_numbers = #tpu.dot_dimension_numbers<[1], [1], [0], [0], [0, 0, 1, 0], [], []>} : vector<16x32xf32>, vector<64x32xf32>, vector<16x64xf32> -> vector<16x64xf32>
    %c0_13 = arith.constant 0 : index
    %c0_14 = arith.constant 0 : index
    %14 = vector.load %arg8[%c0_13, %c0_14] : memref<16x64xf32, #tpu.memory_space<vmem>>, vector<16x64xf32>
    %15 = arith.addf %13, %14 : vector<16x64xf32>
    %cst_15 = arith.constant dense<0xFF800000> : vector<64xf32>
    %16 = vector.multi_reduction <maximumf>, %15, %cst_15 [0] : vector<16x64xf32> to vector<64xf32>
    %17 = vector.shape_cast %16 : vector<64xf32> to vector<1x64xf32>
    %18 = vector.broadcast %17 : vector<1x64xf32> to vector<16x64xf32>
    %19 = arith.subf %15, %18 : vector<16x64xf32>
    %20 = math.exp %19 : vector<16x64xf32>
    %cst_16 = arith.constant dense<0.000000e+00> : vector<64xf32>
    %21 = vector.multi_reduction <add>, %20, %cst_16 [0] : vector<16x64xf32> to vector<64xf32>
    %22 = vector.shape_cast %21 : vector<64xf32> to vector<1x64xf32>
    %23 = tpu.reciprocal %22 {approx = true} : vector<1x64xf32> -> vector<1x64xf32>
    %24 = vector.broadcast %23 : vector<1x64xf32> to vector<16x64xf32>
    %25 = arith.mulf %20, %24 : vector<16x64xf32>
    %cst_17 = arith.constant dense<0.000000e+00> : vector<16x32xf32>
    %26 = tpu.matmul %25, %12, %cst_17 {dimension_numbers = #tpu.dot_dimension_numbers<[1], [0], [0], [1], [0, 0, 1, 1], [], []>} : vector<16x64xf32>, vector<64x32xf32>, vector<16x32xf32> -> vector<16x32xf32>
    %c0_18 = arith.constant 0 : index
    %c0_19 = arith.constant 0 : index
    %27 = vector.load %arg5[%c0_18, %c0_19] : memref<32x32xf32, #tpu.memory_space<vmem>>, vector<32x32xf32>
    %cst_20 = arith.constant dense<0.000000e+00> : vector<16x32xf32>
    %28 = tpu.matmul %26, %27, %cst_20 {dimension_numbers = #tpu.dot_dimension_numbers<[1], [0], [0], [1], [0, 0, 1, 1], [], []>} : vector<16x32xf32>, vector<32x32xf32>, vector<16x32xf32> -> vector<16x32xf32>
    %c0_21 = arith.constant 0 : index
    %c0_22 = arith.constant 0 : index
    %29 = vector.load %arg6[%c0_21, %c0_22] : memref<1x32xf32, #tpu.memory_space<vmem>>, vector<1x32xf32>
    %30 = vector.broadcast %29 : vector<1x32xf32> to vector<16x32xf32>
    %31 = arith.addf %28, %30 : vector<16x32xf32>
    %32 = vector.shape_cast %31 : vector<16x32xf32> to vector<2x8x32xf32>
    %c0_23 = arith.constant 0 : index
    %c0_24 = arith.constant 0 : index
    %c0_25 = arith.constant 0 : index
    %33 = vector.load %arg9[%c0_23, %c0_24, %c0_25] : memref<2x8x32xf32, #tpu.memory_space<vmem>>, vector<2x8x32xf32>
    tpu.vector_store %arg9[%c0_23, %c0_24, %c0_25], %32 {strides = array<i32>} : memref<2x8x32xf32, #tpu.memory_space<vmem>>, vector<2x8x32xf32>,
    return
  }
  func.func @transform_0(%arg0: i32) -> (i32, i32, i32) {
    %c0_i32 = arith.constant 0 : i32
    %c0_i32_0 = arith.constant 0 : i32
    %c0_i32_1 = arith.constant 0 : i32
    %c0_i32_2 = arith.constant 0 : i32
    return %c0_i32, %c0_i32_0, %c0_i32_1 : i32, i32, i32
  }
  func.func @transform_1(%arg0: i32) -> (i32, i32) {
    %c0_i32 = arith.constant 0 : i32
    %c0_i32_0 = arith.constant 0 : i32
    %c0_i32_1 = arith.constant 0 : i32
    return %c0_i32, %c0_i32_0 : i32, i32
  }
  func.func @transform_2(%arg0: i32) -> (i32, i32) {
    %c0_i32 = arith.constant 0 : i32
    %c0_i32_0 = arith.constant 0 : i32
    %c0_i32_1 = arith.constant 0 : i32
    return %c0_i32, %c0_i32_0 : i32, i32
  }
  func.func @transform_3(%arg0: i32) -> (i32, i32) {
    %c0_i32 = arith.constant 0 : i32
    %c0_i32_0 = arith.constant 0 : i32
    %c0_i32_1 = arith.constant 0 : i32
    return %c0_i32, %c0_i32_0 : i32, i32
  }
  func.func @transform_4(%arg0: i32) -> (i32, i32) {
    %c0_i32 = arith.constant 0 : i32
    %c0_i32_0 = arith.constant 0 : i32
    %c0_i32_1 = arith.constant 0 : i32
    return %c0_i32, %c0_i32_0 : i32, i32
  }
  func.func @transform_5(%arg0: i32) -> (i32, i32) {
    %c0_i32 = arith.constant 0 : i32
    %c0_i32_0 = arith.constant 0 : i32
    %c0_i32_1 = arith.constant 0 : i32
    return %c0_i32, %c0_i32_0 : i32, i32
  }
  func.func @transform_6(%arg0: i32) -> (i32, i32) {
    %c0_i32 = arith.constant 0 : i32
    %c0_i32_0 = arith.constant 0 : i32
    %c0_i32_1 = arith.constant 0 : i32
    return %c0_i32, %c0_i32_0 : i32, i32
  }
  func.func @transform_7(%arg0: i32) -> (i32, i32) {
    %c0_i32 = arith.constant 0 : i32
    %c0_i32_0 = arith.constant 0 : i32
    %c0_i32_1 = arith.constant 0 : i32
    return %c0_i32, %c0_i32_0 : i32, i32
  }
  func.func @transform_8(%arg0: i32) -> (i32, i32, i32) {
    %c0_i32 = arith.constant 0 : i32
    %c0_i32_0 = arith.constant 0 : i32
    %c0_i32_1 = arith.constant 0 : i32
    %c0_i32_2 = arith.constant 0 : i32
    return %c0_i32, %c0_i32_0, %c0_i32_1 : i32, i32, i32
  }
}

</mosaic_0001>

<bundles_post_ra>
// kernel: mha_forward.1
= control target key start
LH: loop header
LB: loop body
LE: loop exit
PB: predicated region body
PF: predicated region fallthrough
CT: control target
= control target key end

     0   :  { %13 = vsyncpa [#allocation3], 0  ;;  %s661_s0 = inlined_call_operand.hbm [shape: f32[2,8,32], index: 0, kind: input, shape index: {}]   ;;  %s662_s1 = inlined_call_operand.vmem [shape: f32[32,32], index: 1, kind: input, shape index: {}]   ;;  %s663_s2 = inlined_call_operand.vmem [shape: f32[32,32], index: 2, kind: input, shape index: {}]   ;;  %s664_s3 = inlined_call_operand.vmem [shape: f32[32,32], index: 3, kind: input, shape index: {}]   ;;  %s665_s4 = inlined_call_operand.hbm [shape: f32[32,32], index: 4, kind: input, shape index: {}]   ;;  %s666_s5 = inlined_call_operand.vmem [shape: f32[1,32], index: 5, kind: input, shape index: {}]   ;;  %s667_s6 = inlined_call_operand.vmem [shape: f32[64,32], index: 6, kind: input, shape index: {}]   ;;  %s668_s7 = inlined_call_operand.hbm [shape: f32[16,64], index: 7, kind: input, shape index: {}]   ;;  %s669_s8 = inlined_call_operand.hbm [shape: f32[2,8,32], index: 8, kind: output, shape index: {}]  }
   0x1   :  { %14 = vsyncpa [#allocation6], 0 }
   0x2   :  { %15 = vsyncpa [#allocation4], 0  ;;  %s39_s29 = sshll.u32 %s665_s4, 4  ;;  %s497_s30 = smov [#allocation5]   ;;  %s40_s29 = int_to_ptr.hbm [resolvable:$true] %s39_s29 }
   0x3   :  { %s41_s9 = sshll.u32 %s497_s30, 4  ;;  %s20_s12 = sshll.u32 %s661_s0, 4  ;;  %s42_s9 = int_to_ptr.vmem [resolvable:$true] %s41_s9  ;;  %s21_s12 = int_to_ptr.hbm [resolvable:$true] %s20_s12 }
   0x4   :  { %s498_s13 = smov 128   ;;  %s499_s14 = smov 8  }
   0x5   :  { %47 = dma.hbm_to_vmem [thread:$0]  %s40_s29, 512, %s42_s9, [#allocation6], %s498_s13, %s498_s13, %s499_s14  }
   0x6   :  { %s500_s15 = smov [#allocation2]   ;;  %s56_s4 = sshll.u32 %s668_s7, 4  ;;  %s57_s4 = int_to_ptr.hbm [resolvable:$true] %s56_s4 }
   0x7   :  { %s22_s16 = sshll.u32 %s500_s15, 4  ;;  %s501_s0 = smov [#allocation7]   ;;  %s23_s16 = int_to_ptr.vmem [resolvable:$true] %s22_s16 }
   0x8   :  { %28 = dma.hbm_to_vmem [thread:$0]  %s21_s12, 256, %s23_s16, [#allocation3], %s498_s13, %s498_s13, %s499_s14  }
   0x9   :  { %s58_s19 = sshll.u32 %s501_s0, 4  ;;  %s59_s19 = int_to_ptr.vmem [resolvable:$true] %s58_s19 }
   0xa   :  { %64 = dma.hbm_to_vmem [thread:$0]  %s57_s4, 256, %s59_s19, [#allocation6], %s498_s13, %s498_s13, %s499_s14  }
   0xb   :  { %491 = dma.done.wait [#allocation3], 256  }
   0xc   :  { %492 = vsyncadd [#allocation3], 4294967040 }
   0xd   :  { %493 = dma.done.wait [#allocation6], 768  }
   0xe   :  { %494 = vsyncadd [#allocation6], 4294966528  ;;  %v116_v0 = vld [vmem:[%s663_s2 + $0x18] sm:$0xff]  ;;  %v115_v1 = vld [vmem:[%s663_s2 + $0x10] sm:$0xff]  ;;  %vm83_vm0 = vcmask 261120   ;;  %vm246_vm1 = vcmask 523264  }
   0xf   :  { %129 = vmatpush.msra.mxu1 %v116_v0  ;;  %v114_v2 = vld [vmem:[%s663_s2 + $0x8] sm:$0xff]  ;;  %v82_v3 = vld [vmem:[%s662_s1 + $0x18] sm:$0xff]  ;;  %v81_v4 = vld [vmem:[%s662_s1 + $0x10] sm:$0xff]  ;;  %s502_s12 = smov [#allocation8]   ;;  %s348_s16 = sshll.u32 %s669_s8, 4  ;;  %s349_s16 = int_to_ptr.hbm [resolvable:$true] %s348_s16 }
  0x10   :  { %102 = vmatpush.msra.mxu0 %v82_v3  ;;  %v113_v5 = vld [vmem:[%s663_s2] sm:$0xff]  ;;  %v80_v6 = vld [vmem:[%s662_s1 + $0x8] sm:$0xff]  ;;  %v174_v11 = vld [vmem:[%s667_s6 + $0x38] sm:$0xff]  ;;  %s346_s2 = sshll.u32 %s502_s12, 4  ;;  %s347_s2 = int_to_ptr.vmem [resolvable:$true] %s346_s2 }
  0x11   :  { %130 = vmatpush.msra.mxu1 %v115_v1  ;;  %v77_v7 = vld [vmem:[#allocation2] sm:$0xff]  ;;  %v78_v9 = vld [vmem:[#allocation2 + $0x8] sm:$0xff]  ;;  %v173_v14 = vld [vmem:[%s667_s6 + $0x30] sm:$0xff] }
  0x12   :  { %103 = vmatpush.msra.mxu0 %v81_v4  ;;  %v79_v8 = vld [vmem:[%s662_s1] sm:$0xff]  ;;  %v143_v15 = vld [vmem:[%s664_s3 + $0x18] sm:$0xff]  ;;  %v142_v16 = vld [vmem:[%s664_s3 + $0x10] sm:$0xff] }
  0x13   :  { %131 = vmatpush.msra.mxu1 %v114_v2  ;;  %156 = vmatpush.msra.mxu2 %v143_v15  ;;  %v172_v18 = vld [vmem:[%s667_s6 + $0x28] sm:$0xff]  ;;  %v171_v20 = vld [vmem:[%s667_s6 + $0x20] sm:$0xff]  ;;  %v170_v24 = vld [vmem:[%s667_s6 + $0x18] sm:$0xff] }
  0x14   :  { %104 = vmatpush.msra.mxu0 %v80_v6  ;;  %v141_v21 = vld [vmem:[%s664_s3 + $0x8] sm:$0xff]  ;;  %v140_v22 = vld [vmem:[%s664_s3] sm:$0xff]  ;;  %v169_v26 = vld [vmem:[%s667_s6 + $0x10] sm:$0xff] }
  0x15   :  { %132 = vmatpush.msra.mxu1 %v113_v5  ;;  %157 = vmatpush.msra.mxu2 %v142_v16  ;;  %v168_v28 = vld [vmem:[%s667_s6 + $0x8] sm:$0xff]  ;;  %v167_v30 = vld [vmem:[%s667_s6] sm:$0xff]  ;;  %v191_v44 = vld [vmem:[#allocation7] sm:$0xff] }
  0x16   :  { %364 = vmatmul.msk.f32.vlgmr.msra.gmra.mxu1 %vm83_vm0, %v77_v7  ;;  %105 = vmatpush.msra.mxu0 %v79_v8  ;;  %v192_v46 = vld [vmem:[#allocation7 + $0x8] sm:$0xff]  ;;  %v306_v3 = vld [vmem:[#allocation5 + $0x18] sm:$0xff]  ;;  %v305_v4 = vld [vmem:[#allocation5 + $0x10] sm:$0xff] }
  0x17   :  { %362 = vmatmul.msk.f32.vlgmr.msra.gmra.mxu0 %vm83_vm0, %v77_v7  ;;  %158 = vmatpush.msra.mxu2 %v141_v21  ;;  %v304_v6 = vld [vmem:[#allocation5 + $0x8] sm:$0xff]  ;;  %v303_v8 = vld [vmem:[#allocation5] sm:$0xff] }
  0x18   :  { %329 = vmatpush.msrb.mxu1 %v306_v3 }
  0x19   :  { %159 = vmatpush.msra.mxu2 %v140_v22 }
  0x1a   :  { %366 = vmatmul.msk.f32.vlgmr.msra.gmra.mxu2 %vm83_vm0, %v77_v7  ;;  %330 = vmatpush.msrb.mxu1 %v305_v4 }
  0x1c   :  { %331 = vmatpush.msrb.mxu1 %v304_v6 }
  0x1e   :  { %365 = vmatmul.msk.f32.gmra.mxu1 %vm83_vm0, %v78_v9 }
  0x1f   :  { %363 = vmatmul.msk.f32.gmra.mxu0 %vm83_vm0, %v78_v9  ;;  %332 = vmatpush.msrb.mxu1 %v303_v8 }
  0x22   :  { %367 = vmatmul.msk.f32.gmra.mxu2 %vm83_vm0, %v78_v9 }
  0x93   :  { %v134_v10 = vpop.f32.mrf.mxu1 }
  0x94   :  { %v181_v17 = vmul.f32 %v173_v14, %v134_v10  ;;  %v179_v23 = vmul.f32 %v171_v20, %v134_v10  ;;  %v177_v27 = vmul.f32 %v169_v26, %v134_v10  ;;  %v175_v31 = vmul.f32 %v167_v30, %v134_v10  ;;  %v107_v32 = vpop.f32.mrf.mxu0 }
  0x9b   :  { %v137_v12 = vpop.f32.mrf.mxu1 }
  0x9c   :  { %v182_v13 = vmul.f32 %v174_v11, %v137_v12  ;;  %v180_v19 = vmul.f32 %v172_v18, %v137_v12  ;;  %v178_v25 = vmul.f32 %v170_v24, %v137_v12  ;;  %v176_v29 = vmul.f32 %v168_v28, %v137_v12  ;;  %v110_v33 = vpop.f32.mrf.mxu0 }
  0x9d   :  { %v161_v34 = vpop.f32.mrf.mxu2 }
  0x9e   :  { %368 = vmatpush.xpose.msk.msra.mxu3 %vm83_vm0, %v182_v13  ;;  %v189_v37 = vmul.f32 %v173_v14, %v161_v34  ;;  %v187_v39 = vmul.f32 %v171_v20, %v161_v34  ;;  %v185_v42 = vmul.f32 %v169_v26, %v161_v34  ;;  %v183_v45 = vmul.f32 %v167_v30, %v161_v34 }
  0xa2   :  { %369 = vmatpush.xpose.msk.msra.mxu3 %vm83_vm0, %v181_v17 }
  0xa5   :  { %v164_v35 = vpop.f32.mrf.mxu2 }
  0xa6   :  { %370 = vmatpush.xpose.msk.msra.mxu3 %vm83_vm0, %v180_v19  ;;  %v190_v36 = vmul.f32 %v174_v11, %v164_v35  ;;  %v188_v38 = vmul.f32 %v172_v18, %v164_v35  ;;  %v186_v40 = vmul.f32 %v170_v24, %v164_v35  ;;  %v184_v43 = vmul.f32 %v168_v28, %v164_v35  ;;  %v388_v19 = vld [vmem:[%s666_s5] ss:$0 sm:$0xff] }
  0xa8   :  { %288 = vmatpush.msrb.mxu0 %v190_v36 }
  0xaa   :  { %371 = vmatpush.xpose.msk.msra.mxu3 %vm83_vm0, %v179_v23  ;;  %289 = vmatpush.msrb.mxu0 %v189_v37 }
  0xac   :  { %290 = vmatpush.msrb.mxu0 %v188_v38 }
  0xae   :  { %372 = vmatpush.xpose.msk.msra.mxu3 %vm83_vm0, %v178_v25  ;;  %291 = vmatpush.msrb.mxu0 %v187_v39 }
  0xb0   :  { %292 = vmatpush.msrb.mxu0 %v186_v40 }
  0xb2   :  { %373 = vmatpush.xpose.msk.msra.mxu3 %vm83_vm0, %v177_v27  ;;  %293 = vmatpush.msrb.mxu0 %v185_v42 }
  0xb4   :  { %294 = vmatpush.msrb.mxu0 %v184_v43 }
  0xb6   :  { %374 = vmatpush.xpose.msk.msra.mxu3 %vm83_vm0, %v176_v29  ;;  %295 = vmatpush.msrb.mxu0 %v183_v45 }
  0xba   :  { %375 = vmatpush.xpose.msk.msra.mxu3 %vm83_vm0, %v175_v31 }
  0xbd   :  { %376 = vmatmul.msk.f32.vlgmr.msra.gmra.mxu3 %vm83_vm0, %v107_v32 }
  0xc5   :  { %377 = vmatmul.msk.f32.gmra.mxu3 %vm83_vm0, %v110_v33 }
 0x140   :  { %v240_v41 = vpop.f32.mrf.mxu3 }
 0x141   :  { %v241_v47 = vadd.f32 %v240_v41, %v191_v44 }
 0x143   :  { %v247_v50 = vsel %vm246_vm1, %v241_v47, -inf }
 0x148   :  { %v243_v48 = vpop.f32.mrf.mxu3 }
 0x149   :  { %v244_v49 = vadd.f32 %v243_v48, %v192_v46 }
 0x14b   :  { %v248_v51 = vsel %vm246_vm1, %v244_v49, -inf }
 0x14c   :  { %v249_v52 = vmax.f32 %v247_v50, %v248_v51 }
 0x14e   :  { %v250_v53 = vrot.slane %v249_v52, 4 }
 0x150   :  { %v251_v54 = vmax.f32 %v249_v52, %v250_v53 }
 0x152   :  { %v252_v55 = vrot.slane %v251_v54, 2 }
 0x154   :  { %v253_v56 = vmax.f32 %v251_v54, %v252_v55 }
 0x156   :  { %v254_v57 = vrot.slane %v253_v56, 1 }
 0x158   :  { %v255_v58 = vmax.f32 %v253_v56, %v254_v57 }
 0x15a   :  { %v256_v59 = vsub.f32 %v241_v47, %v255_v58  ;;  %v257_v60 = vsub.f32 %v244_v49, %v255_v58 }
 0x15c   :  { %v258_v61 = vmul.f32 1.442695, %v256_v59  ;;  %v260_v62 = vmul.f32 1.442695, %v257_v60 }
 0x15e   :  { %389 = vpow2.f32 %v258_v61 }
 0x15f   :  { %391 = vpow2.f32 %v260_v62 }
 0x164   :  { %v390_v63 = vpop.eup %389 }
 0x165   :  { %v392_v0 = vpop.eup %391  ;;  %v262_v1 = vsel %vm246_vm1, %v390_v63, 0.0 }
 0x166   :  { %v263_v2 = vsel %vm246_vm1, %v392_v0, 0.0 }
 0x167   :  { %v264_v5 = vadd.f32 %v263_v2, %v262_v1 }
 0x169   :  { %v265_v7 = vrot.slane %v264_v5, 4 }
 0x16b   :  { %v266_v9 = vadd.f32 %v265_v7, %v264_v5 }
 0x16d   :  { %v267_v10 = vrot.slane %v266_v9, 2 }
 0x16f   :  { %v268_v11 = vadd.f32 %v267_v10, %v266_v9 }
 0x171   :  { %v269_v12 = vrot.slane %v268_v11, 1 }
 0x173   :  { %v270_v13 = vadd.f32 %v269_v12, %v268_v11 }
 0x175   :  { %393 = vrcp.f32 %v270_v13 }
 0x17b   :  { %v394_v14 = vpop.eup %393 }
 0x17c   :  { %v272_v15 = vmul.f32 %v394_v14, %v390_v63  ;;  %v273_v16 = vmul.f32 %v394_v14, %v392_v0 }
 0x17e   :  { %378 = vmatmul.msk.f32.vlgmr.msrb.gmra.mxu0 %vm246_vm1, %v272_v15 }
 0x186   :  { %379 = vmatmul.msk.f32.gmra.mxu0 %vm246_vm1, %v273_v16 }
 0x1fb   :  { %v297_v17 = vpop.f32.mrf.mxu0 }
 0x1fc   :  { %380 = vmatmul.msk.f32.vlgmr.msrb.gmra.mxu1 %vm83_vm0, %v297_v17 }
 0x203   :  { %v300_v18 = vpop.f32.mrf.mxu0 }
 0x204   :  { %381 = vmatmul.msk.f32.gmra.mxu1 %vm83_vm0, %v300_v18 }
 0x279   :  { %v334_v20 = vpop.f32.mrf.mxu1 }
 0x27a   :  { %v335_v21 = vadd.f32 %v388_v19, %v334_v20 }
 0x27c   :  { %340 = vst.msk [vmem:[#allocation8] sm:$0xff] %vm83_vm0, %v335_v21 }
 0x281   :  { %v337_v22 = vpop.f32.mrf.mxu1 }
 0x282   :  { %v338_v23 = vadd.f32 %v388_v19, %v337_v22 }
 0x284   :  { %341 = vst.msk [vmem:[#allocation8 + $0x8] sm:$0xff] %vm83_vm0, %v338_v23 }
 0x285   :  { %354 = dma.vmem_to_hbm [thread:$0]  %s347_s2, 256, %s349_s16, [#allocation4], %s498_s13, %s498_s13, %s499_s14  }
 0x286   :  { %495 = dma.done.wait [#allocation4], 256  }
 0x287   :  { %496 = vsyncadd [#allocation4], 4294967040 }
 0x288   :  { %359 = vsyncpa [#allocation3], 1 }
 0x289   :  { %360 = vsyncpa [#allocation6], 1 }
 0x28a   :  { %361 = vsyncpa [#allocation4], 1 }

</bundles_post_ra>
